<compile_context>
chip_gen: v5e
topology: v5e:2x2
jax: 0.10.0
libtpu: 0.0.40
codegen_flags: <defaults>
</compile_context>

<pallas_src>
import functools
import math

import jax
import jax.numpy as jnp
import numpy as np
from jax import lax
from jax.experimental import pallas as pl
from jax.experimental.pallas import tpu as pltpu


HEAD_PAD = 128      # lane-dense fused pi+value head width (multiple of 128)
HIDDEN_PAD = 128    # hidden layer widths padded to a full vreg lane width
F_PAD_MULT = 8      # pad the tiny contraction dim once in HBM (sublane align)
VALUE_PAD = 8       # width of the tiny f32 value output (lane 0 is used)
ROW_ALIGN = 128     # row-padding quantum for larger batches
TM_DEFAULT = 256    # row tile; 512 spills vregs in the softmax epilogue


def _round_up(x, m):
    return (x + m - 1) // m * m


def _choose_tm(n_pad):
    """Row-tile size. n_pad is a multiple of 8 (<=128) or of 128 (>128)."""
    if n_pad <= ROW_ALIGN:
        return n_pad                       # tiny batch: single grid step
    if n_pad % TM_DEFAULT == 0 and n_pad >= 2 * TM_DEFAULT:
        return TM_DEFAULT                  # >= 2 steps -> v7x megacore sharding
    return ROW_ALIGN


# ----------------------------- Pallas kernel --------------------------------
def _cartpole_ff_kernel(x_ref, w1_ref, b1_ref, w2_ref, b2_ref,
                        wh_ref, bh_ref, pi_ref, val_ref, *, num_actions):
    # x arrives f32; cast to bf16 in-kernel (MXU-native), accumulate in f32.
    x = x_ref[...].astype(jnp.bfloat16)

    h1 = jnp.dot(x, w1_ref[...], preferred_element_type=jnp.float32) + b1_ref[...]
    h1 = jnp.maximum(h1, 0.0).astype(jnp.bfloat16)

    h2 = jnp.dot(h1, w2_ref[...], preferred_element_type=jnp.float32) + b2_ref[...]
    h2 = jnp.maximum(h2, 0.0).astype(jnp.bfloat16)

    # Fused pi+value head: lanes [0, A) = policy logits, lane A = value,
    # lanes > A carry zero weights / zero bias.
    logits = jnp.dot(h2, wh_ref[...], preferred_element_type=jnp.float32) + bh_ref[...]

    lane = lax.broadcasted_iota(jnp.int32, logits.shape, 1)
    masked = jnp.where(lane < num_actions, logits, -jnp.inf)
    m = jnp.max(masked, axis=-1, keepdims=True)
    e = jnp.exp(masked - m)                               # 0 on non-policy lanes
    s = jnp.sum(e, axis=-1, keepdims=True)
    r = pl.reciprocal(s, approx=True)                     # EUP slot (~free)
    r = r * (2.0 - s * r)                                 # one Newton step -> f32 accuracy
    pi_ref[...] = (e * r).astype(pi_ref.dtype)            # lane-dense bf16 store

    # Value: pick lane `num_actions` via a masked lane-reduce (no layout
    # shuffles) and replicate it across the tiny 8-lane f32 output.
    v = jnp.sum(jnp.where(lane == num_actions, logits, 0.0), axis=-1, keepdims=True)
    val_ref[...] = jnp.broadcast_to(v, val_ref.shape)


def _cartpole_ff_call(x_f32, params, num_actions):
    """x_f32: [n_pad, f_pad] f32 (rows/features zero-padded).
    Returns (pi_packed [n_pad, 128] bf16, value [n_pad, 8] f32)."""
    n_pad, f_pad = x_f32.shape
    h1 = params["w1"].shape[1]
    h2 = params["w2"].shape[1]

    tm = _choose_tm(n_pad)
    grid = (n_pad // tm,)

    def resident(shape):
        return pl.BlockSpec(shape, lambda i: (0, 0))

    weight_elems = f_pad * h1 + h1 * h2 + h2 * HEAD_PAD
    cost = pl.CostEstimate(
        flops=2 * n_pad * weight_elems,
        transcendentals=n_pad * HEAD_PAD,
        bytes_accessed=(x_f32.size * 4
                        + n_pad * HEAD_PAD * 2 + n_pad * VALUE_PAD * 4
                        + weight_elems * 2 + (h1 + h2 + HEAD_PAD) * 4),
    )

    return pl.pallas_call(
        functools.partial(_cartpole_ff_kernel, num_actions=num_actions),
        grid=grid,
        in_specs=[
            pl.BlockSpec((tm, f_pad), lambda i: (i, 0)),        # x: tiled over rows
            resident((f_pad, h1)), resident((1, h1)),           # w1, b1 (resident)
            resident((h1, h2)), resident((1, h2)),              # w2, b2
            resident((h2, HEAD_PAD)), resident((1, HEAD_PAD)),  # fused pi+value head
        ],
        out_specs=(
            pl.BlockSpec((tm, HEAD_PAD), lambda i: (i, 0)),     # bf16 pi slab
            pl.BlockSpec((tm, VALUE_PAD), lambda i: (i, 0)),    # f32 value
        ),
        out_shape=(
            jax.ShapeDtypeStruct((n_pad, HEAD_PAD), jnp.bfloat16),
            jax.ShapeDtypeStruct((n_pad, VALUE_PAD), jnp.float32),
        ),
        compiler_params=pltpu.CompilerParams(
            dimension_semantics=("parallel",)),                 # megacore on v7x
        cost_estimate=cost,
    )(x_f32, params["w1"], params["b1"], params["w2"], params["b2"],
      params["wh"], params["bh"])


# ------------------------- parameter initialization --------------------------
def init_params(key, input_size, fc_sizes, output_size):
    """Matches the module's init (xavier_normal_ weights, PyTorch-default
    uniform biases), then packs for the kernel: [in, out] layout, K padded,
    hidden dims padded to 128, pi/value heads fused + lane-padded to 128,
    weights bf16, biases f32."""
    def xavier_normal(k, fan_in, fan_out):
        std = math.sqrt(2.0 / (fan_in + fan_out))
        return std * jax.random.normal(k, (fan_in, fan_out), dtype=jnp.float32)

    def torch_bias(k, fan_in, fan_out):
        bound = 1.0 / math.sqrt(fan_in)
        return jax.random.uniform(k, (1, fan_out), dtype=jnp.float32,
                                  minval=-bound, maxval=bound)

    keys = jax.random.split(key, 8)
    h1, h2 = fc_sizes
    f_pad = _round_up(input_size, F_PAD_MULT)
    h1p = _round_up(h1, HIDDEN_PAD)
    h2p = _round_up(h2, HIDDEN_PAD)

    w1 = xavier_normal(keys[0], input_size, h1)
    b1 = torch_bias(keys[1], input_size, h1)
    w2 = xavier_normal(keys[2], h1, h2)
    b2 = torch_bias(keys[3], h1, h2)
    wpi = xavier_normal(keys[4], h2, output_size)
    bpi = torch_bias(keys[5], h2, output_size)
    wv = xavier_normal(keys[6], h2, 1)
    bv = torch_bias(keys[7], h2, 1)

    # Zero-pad K once (4 -> 8) and the hidden widths (64 -> 128): padded
    # lanes/rows carry zero weights and zero bias, so ReLU keeps them at 0 and
    # they contribute nothing downstream -- math is unchanged.
    w1p = jnp.zeros((f_pad, h1p), jnp.float32).at[:input_size, :h1].set(w1)
    b1p = jnp.zeros((1, h1p), jnp.float32).at[:, :h1].set(b1)
    w2p = jnp.zeros((h1p, h2p), jnp.float32).at[:h1, :h2].set(w2)
    b2p = jnp.zeros((1, h2p), jnp.float32).at[:, :h2].set(b2)
    # Fuse pi + value into one lane-dense [h2p, 128] weight / [1, 128] bias.
    wh = (jnp.zeros((h2p, HEAD_PAD), jnp.float32)
          .at[:h2, :output_size].set(wpi)
          .at[:h2, output_size:output_size + 1].set(wv))
    bh = (jnp.zeros((1, HEAD_PAD), jnp.float32)
          .at[:, :output_size].set(bpi)
          .at[:, output_size:output_size + 1].set(bv))

    return {
        "w1": w1p.astype(jnp.bfloat16), "b1": b1p,
        "w2": w2p.astype(jnp.bfloat16), "b2": b2p,
        "wh": wh.astype(jnp.bfloat16), "bh": bh,
    }


# ------------------------------ forward wrapper ------------------------------
@functools.partial(jax.jit, static_argnames=("num_actions",))
def cartpole_ff_forward(params, in_state, prev_action=None, prev_reward=None,
                        *, num_actions=2):
    """Mirrors CartpoleFfModel.forward: accepts leading dims [T,B], [B] or [],
    flattens to [T*B, F], runs head MLP + fused pi/value, restores lead dims."""
    state = in_state.astype(jnp.float32)
    lead_shape = state.shape[:-1]                 # infer_leading_dims(state, 1)
    feat = state.shape[-1]
    n = int(np.prod(lead_shape)) if lead_shape else 1
    x = state.reshape(n, feat)

    f_pad = params["w1"].shape[0]
    n_pad = _round_up(n, 8) if n <= ROW_ALIGN else _round_up(n, ROW_ALIGN)
    # stays f32: the bf16 cast happens inside the kernel
    x = jnp.pad(x, ((0, n_pad - n), (0, f_pad - feat)))

    pi_packed, v_packed = _cartpole_ff_call(x, params, num_actions)

    pi = pi_packed[:n, :num_actions].astype(jnp.float32)
    pi = pi.reshape(lead_shape + (num_actions,))
    v = v_packed[:n, 0].reshape(lead_shape)        # value head, squeezed
    return pi, v


# ------------------------------ pure-JAX reference ---------------------------
def reference_forward(params, x_f32, num_actions):
    """Same math as the kernel (bf16 operands, f32 accum), exact softmax."""
    f_pad = params["w1"].shape[0]
    xb = jnp.pad(x_f32, ((0, 0), (0, f_pad - x_f32.shape[-1]))).astype(jnp.bfloat16)
    h1 = jnp.dot(xb, params["w1"], preferred_element_type=jnp.float32) + params["b1"]
    h1 = jnp.maximum(h1, 0.0).astype(jnp.bfloat16)
    h2 = jnp.dot(h1, params["w2"], preferred_element_type=jnp.float32) + params["b2"]
    h2 = jnp.maximum(h2, 0.0).astype(jnp.bfloat16)
    logits = jnp.dot(h2, params["wh"], preferred_element_type=jnp.float32) + params["bh"]
    pi = jax.nn.softmax(logits[:, :num_actions], axis=-1)
    v = logits[:, num_actions]
    return pi, v


# ----------------------------------- main ------------------------------------
if __name__ == "__main__":
    key = jax.random.PRNGKey(0)
    k_params, k_state, k_state2 = jax.random.split(key, 3)

    # Cartpole-like shapes: image_shape[0] = 4 state features, 2 actions.
    input_size = 4
    output_size = 2
    fc_sizes = [64, 64]
    T, B = 4, 2

    params = init_params(k_params, input_size, fc_sizes, output_size)

    in_state = jax.random.normal(k_state, (T, B, input_size), dtype=jnp.float32)
    prev_action = jnp.zeros((T, B), dtype=jnp.int32)    # unused by forward
    prev_reward = jnp.zeros((T, B), dtype=jnp.float32)  # unused by forward

    pi, v = cartpole_ff_forward(params, in_state, prev_action, prev_reward,
                                num_actions=output_size)
    jax.block_until_ready((pi, v))

    assert pi.shape == (T, B, output_size)
    assert v.shape == (T, B)
    # softmax rows must sum to ~1 (bf16 output slab -> small rounding)
    assert np.allclose(np.asarray(jnp.sum(pi, axis=-1)), 1.0, atol=5e-3)

    # compare against a pure-JAX reference using the same packed bf16 weights
    pi_ref, v_ref = reference_forward(params, in_state.reshape(T * B, input_size),
                                      output_size)
    assert np.allclose(np.asarray(pi).reshape(T * B, output_size),
                       np.asarray(pi_ref), atol=5e-3)
    assert np.allclose(np.asarray(v).reshape(T * B),
                       np.asarray(v_ref), atol=1e-3, rtol=1e-3)

    # Larger, non-aligned batch: exercises 128-row padding and the >=2-step
    # grid (so the "parallel" axis can shard across both v7x TensorCores).
    T2, B2 = 37, 5
    in_state2 = jax.random.normal(k_state2, (T2, B2, input_size), dtype=jnp.float32)
    pi2, v2 = cartpole_ff_forward(params, in_state2, num_actions=output_size)
    jax.block_until_ready((pi2, v2))
    pi2_ref, v2_ref = reference_forward(params, in_state2.reshape(T2 * B2, input_size),
                                        output_size)
    assert pi2.shape == (T2, B2, output_size)
    assert v2.shape == (T2, B2)
    assert np.allclose(np.asarray(pi2).reshape(T2 * B2, output_size),
                       np.asarray(pi2_ref), atol=5e-3)
    assert np.allclose(np.asarray(v2).reshape(T2 * B2),
                       np.asarray(v2_ref), atol=1e-3, rtol=1e-3)

    print("KERNEL_OK")
</pallas_src>

<mosaic_0001>
module attributes {stable_mosaic.version = 11 : i64} {
  func.func @_cartpole_ff_kernel(%arg0: i32, %arg1: memref<8x8xf32, #tpu.memory_space<vmem>>, %arg2: memref<8x128xbf16, #tpu.memory_space<vmem>>, %arg3: memref<1x128xf32, #tpu.memory_space<vmem>>, %arg4: memref<128x128xbf16, #tpu.memory_space<vmem>>, %arg5: memref<1x128xf32, #tpu.memory_space<vmem>>, %arg6: memref<128x128xbf16, #tpu.memory_space<vmem>>, %arg7: memref<1x128xf32, #tpu.memory_space<vmem>>, %arg8: memref<8x128xbf16, #tpu.memory_space<vmem>>, %arg9: memref<8x8xf32, #tpu.memory_space<vmem>>) attributes {dimension_semantics = [#tpu.dimension_semantics<parallel>], iteration_bounds = array<i64: 1>, scalar_prefetch = 0 : i64, scratch_operands = 0 : i64, tpu.core_type = #tpu.core_type<tc>, window_params = [{transform_indices = @transform_0, window_bounds = array<i64: 8, 8>}, {pipeline_mode = #tpu.pipeline_mode<synchronous>, transform_indices = @transform_1, window_bounds = array<i64: 8, 128>}, {pipeline_mode = #tpu.pipeline_mode<synchronous>, transform_indices = @transform_2, window_bounds = array<i64: 1, 128>}, {pipeline_mode = #tpu.pipeline_mode<synchronous>, transform_indices = @transform_3, window_bounds = array<i64: 128, 128>}, {pipeline_mode = #tpu.pipeline_mode<synchronous>, transform_indices = @transform_4, window_bounds = array<i64: 1, 128>}, {pipeline_mode = #tpu.pipeline_mode<synchronous>, transform_indices = @transform_5, window_bounds = array<i64: 128, 128>}, {pipeline_mode = #tpu.pipeline_mode<synchronous>, transform_indices = @transform_6, window_bounds = array<i64: 1, 128>}, {transform_indices = @transform_7, window_bounds = array<i64: 8, 128>}, {transform_indices = @transform_8, window_bounds = array<i64: 8, 8>}]} {
    %c0 = arith.constant 0 : index
    %c0_0 = arith.constant 0 : index
    %0 = vector.load %arg1[%c0, %c0_0] : memref<8x8xf32, #tpu.memory_space<vmem>>, vector<8x8xf32>
    %1 = arith.truncf %0 : vector<8x8xf32> to vector<8x8xbf16>
    %c0_1 = arith.constant 0 : index
    %c0_2 = arith.constant 0 : index
    %2 = vector.load %arg2[%c0_1, %c0_2] : memref<8x128xbf16, #tpu.memory_space<vmem>>, vector<8x128xbf16>
    %cst = arith.constant dense<0.000000e+00> : vector<8x128xf32>
    %3 = tpu.matmul %1, %2, %cst {dimension_numbers = #tpu.dot_dimension_numbers<[1], [0], [0], [1], [0, 0, 1, 1], [], []>} : vector<8x8xbf16>, vector<8x128xbf16>, vector<8x128xf32> -> vector<8x128xf32>
    %c0_3 = arith.constant 0 : index
    %c0_4 = arith.constant 0 : index
    %4 = vector.load %arg3[%c0_3, %c0_4] : memref<1x128xf32, #tpu.memory_space<vmem>>, vector<1x128xf32>
    %5 = vector.broadcast %4 : vector<1x128xf32> to vector<8x128xf32>
    %6 = arith.addf %3, %5 : vector<8x128xf32>
    %cst_5 = arith.constant 0.000000e+00 : f32
    %7 = vector.broadcast %cst_5 : f32 to vector<8x128xf32>
    %8 = arith.maximumf %6, %7 : vector<8x128xf32>
    %9 = arith.truncf %8 : vector<8x128xf32> to vector<8x128xbf16>
    %c0_6 = arith.constant 0 : index
    %c0_7 = arith.constant 0 : index
    %10 = vector.load %arg4[%c0_6, %c0_7] : memref<128x128xbf16, #tpu.memory_space<vmem>>, vector<128x128xbf16>
    %cst_8 = arith.constant dense<0.000000e+00> : vector<8x128xf32>
    %11 = tpu.matmul %9, %10, %cst_8 {dimension_numbers = #tpu.dot_dimension_numbers<[1], [0], [0], [1], [0, 0, 1, 1], [], []>} : vector<8x128xbf16>, vector<128x128xbf16>, vector<8x128xf32> -> vector<8x128xf32>
    %c0_9 = arith.constant 0 : index
    %c0_10 = arith.constant 0 : index
    %12 = vector.load %arg5[%c0_9, %c0_10] : memref<1x128xf32, #tpu.memory_space<vmem>>, vector<1x128xf32>
    %13 = vector.broadcast %12 : vector<1x128xf32> to vector<8x128xf32>
    %14 = arith.addf %11, %13 : vector<8x128xf32>
    %cst_11 = arith.constant 0.000000e+00 : f32
    %15 = vector.broadcast %cst_11 : f32 to vector<8x128xf32>
    %16 = arith.maximumf %14, %15 : vector<8x128xf32>
    %17 = arith.truncf %16 : vector<8x128xf32> to vector<8x128xbf16>
    %c0_12 = arith.constant 0 : index
    %c0_13 = arith.constant 0 : index
    %18 = vector.load %arg6[%c0_12, %c0_13] : memref<128x128xbf16, #tpu.memory_space<vmem>>, vector<128x128xbf16>
    %cst_14 = arith.constant dense<0.000000e+00> : vector<8x128xf32>
    %19 = tpu.matmul %17, %18, %cst_14 {dimension_numbers = #tpu.dot_dimension_numbers<[1], [0], [0], [1], [0, 0, 1, 1], [], []>} : vector<8x128xbf16>, vector<128x128xbf16>, vector<8x128xf32> -> vector<8x128xf32>
    %c0_15 = arith.constant 0 : index
    %c0_16 = arith.constant 0 : index
    %20 = vector.load %arg7[%c0_15, %c0_16] : memref<1x128xf32, #tpu.memory_space<vmem>>, vector<1x128xf32>
    %21 = vector.broadcast %20 : vector<1x128xf32> to vector<8x128xf32>
    %22 = arith.addf %19, %21 : vector<8x128xf32>
    %23 = tpu.iota {dimensions = array<i32: 1>} : vector<8x128xi32>
    %c2_i32 = arith.constant 2 : i32
    %24 = vector.broadcast %c2_i32 : i32 to vector<8x128xi32>
    %25 = arith.cmpi slt, %23, %24 : vector<8x128xi32>
    %cst_17 = arith.constant 0xFF800000 : f32
    %26 = vector.broadcast %cst_17 : f32 to vector<8x128xf32>
    %27 = arith.select %25, %22, %26 : vector<8x128xi1>, vector<8x128xf32>
    %cst_18 = arith.constant dense<0xFF800000> : vector<8xf32>
    %28 = vector.multi_reduction <maximumf>, %27, %cst_18 [1] : vector<8x128xf32> to vector<8xf32>
    %29 = vector.shape_cast %28 : vector<8xf32> to vector<8x1xf32>
    %30 = vector.broadcast %29 : vector<8x1xf32> to vector<8x128xf32>
    %31 = arith.subf %27, %30 : vector<8x128xf32>
    %32 = math.exp %31 : vector<8x128xf32>
    %cst_19 = arith.constant dense<0.000000e+00> : vector<8xf32>
    %33 = vector.multi_reduction <add>, %32, %cst_19 [1] : vector<8x128xf32> to vector<8xf32>
    %34 = vector.shape_cast %33 : vector<8xf32> to vector<8x1xf32>
    %35 = tpu.reciprocal %34 {approx = true} : vector<8x1xf32> -> vector<8x1xf32>
    %36 = arith.mulf %34, %35 : vector<8x1xf32>
    %cst_20 = arith.constant 2.000000e+00 : f32
    %37 = vector.broadcast %cst_20 : f32 to vector<8x1xf32>
    %38 = arith.subf %37, %36 : vector<8x1xf32>
    %39 = arith.mulf %35, %38 : vector<8x1xf32>
    %40 = vector.broadcast %39 : vector<8x1xf32> to vector<8x128xf32>
    %41 = arith.mulf %32, %40 : vector<8x128xf32>
    %42 = arith.truncf %41 : vector<8x128xf32> to vector<8x128xbf16>
    %c0_21 = arith.constant 0 : index
    %c0_22 = arith.constant 0 : index
    %43 = vector.load %arg8[%c0_21, %c0_22] : memref<8x128xbf16, #tpu.memory_space<vmem>>, vector<8x128xbf16>
    tpu.vector_store %arg8[%c0_21, %c0_22], %42 {strides = array<i32>} : memref<8x128xbf16, #tpu.memory_space<vmem>>, vector<8x128xbf16>,
    %c2_i32_23 = arith.constant 2 : i32
    %44 = vector.broadcast %c2_i32_23 : i32 to vector<8x128xi32>
    %45 = arith.cmpi eq, %23, %44 : vector<8x128xi32>
    %cst_24 = arith.constant 0.000000e+00 : f32
    %46 = vector.broadcast %cst_24 : f32 to vector<8x128xf32>
    %47 = arith.select %45, %22, %46 : vector<8x128xi1>, vector<8x128xf32>
    %cst_25 = arith.constant dense<0.000000e+00> : vector<8xf32>
    %48 = vector.multi_reduction <add>, %47, %cst_25 [1] : vector<8x128xf32> to vector<8xf32>
    %49 = vector.shape_cast %48 : vector<8xf32> to vector<8x1xf32>
    %50 = vector.shape_cast %49 : vector<8x1xf32> to vector<8x1xf32>
    %51 = vector.broadcast %50 : vector<8x1xf32> to vector<8x8xf32>
    %c0_26 = arith.constant 0 : index
    %c0_27 = arith.constant 0 : index
    %52 = vector.load %arg9[%c0_26, %c0_27] : memref<8x8xf32, #tpu.memory_space<vmem>>, vector<8x8xf32>
    tpu.vector_store %arg9[%c0_26, %c0_27], %51 {strides = array<i32>} : memref<8x8xf32, #tpu.memory_space<vmem>>, vector<8x8xf32>,
    return
  }
  func.func @transform_0(%arg0: i32) -> (i32, i32) {
    %c0_i32 = arith.constant 0 : i32
    %c0_i32_0 = arith.constant 0 : i32
    return %arg0, %c0_i32 : i32, i32
  }
  func.func @transform_1(%arg0: i32) -> (i32, i32) {
    %c0_i32 = arith.constant 0 : i32
    %c0_i32_0 = arith.constant 0 : i32
    %c0_i32_1 = arith.constant 0 : i32
    return %c0_i32, %c0_i32_0 : i32, i32
  }
  func.func @transform_2(%arg0: i32) -> (i32, i32) {
    %c0_i32 = arith.constant 0 : i32
    %c0_i32_0 = arith.constant 0 : i32
    %c0_i32_1 = arith.constant 0 : i32
    return %c0_i32, %c0_i32_0 : i32, i32
  }
  func.func @transform_3(%arg0: i32) -> (i32, i32) {
    %c0_i32 = arith.constant 0 : i32
    %c0_i32_0 = arith.constant 0 : i32
    %c0_i32_1 = arith.constant 0 : i32
    return %c0_i32, %c0_i32_0 : i32, i32
  }
  func.func @transform_4(%arg0: i32) -> (i32, i32) {
    %c0_i32 = arith.constant 0 : i32
    %c0_i32_0 = arith.constant 0 : i32
    %c0_i32_1 = arith.constant 0 : i32
    return %c0_i32, %c0_i32_0 : i32, i32
  }
  func.func @transform_5(%arg0: i32) -> (i32, i32) {
    %c0_i32 = arith.constant 0 : i32
    %c0_i32_0 = arith.constant 0 : i32
    %c0_i32_1 = arith.constant 0 : i32
    return %c0_i32, %c0_i32_0 : i32, i32
  }
  func.func @transform_6(%arg0: i32) -> (i32, i32) {
    %c0_i32 = arith.constant 0 : i32
    %c0_i32_0 = arith.constant 0 : i32
    %c0_i32_1 = arith.constant 0 : i32
    return %c0_i32, %c0_i32_0 : i32, i32
  }
  func.func @transform_7(%arg0: i32) -> (i32, i32) {
    %c0_i32 = arith.constant 0 : i32
    %c0_i32_0 = arith.constant 0 : i32
    return %arg0, %c0_i32 : i32, i32
  }
  func.func @transform_8(%arg0: i32) -> (i32, i32) {
    %c0_i32 = arith.constant 0 : i32
    %c0_i32_0 = arith.constant 0 : i32
    return %arg0, %c0_i32 : i32, i32
  }
}

</mosaic_0001>

<bundles_post_ra>
// kernel: squeeze.1
= control target key start
LH: loop header
LB: loop body
LE: loop exit
PB: predicated region body
PF: predicated region fallthrough
CT: control target
= control target key end

     0   :  { %s37_s8 = smov 122   ;;  %s38_s9 = smov 124   ;;  %vm7_vm0 = vcmask 15360   ;;  %s55_s0 = inlined_call_operand.vmem [shape: f32[8], index: 0, kind: input, shape index: {}]   ;;  %s56_s1 = inlined_call_operand.vmem [shape: f32[4,2], index: 1, kind: output, shape index: {}]  }
   0x1   :  { %v4_v0 = vld [vmem:[%s55_s0] sm:$0x1]  ;;  %s36_s0 = smov 126  }
   0x2   :  { %5 = vst [vmem:[#allocation1] sm:$0x1] %v4_v0 }
   0x9   :  { %v9_v1 = vld [vmem:[#allocation1] sm:$0x1]  }
   0xa   :  { %v21_v2 = vld [vmem:[#allocation1] sm:$0x1]   ;;  %10 = vrot.lane.b32.xlu0 %v9_v1, %s36_s0 }
   0xb   :  { %22 = vrot.lane.b32.xlu1 %v21_v2, %s37_s8  ;;  %v15_v3 = vld [vmem:[#allocation1] sm:$0x1]  }
   0xc   :  { %v6_v4 = vld [vmem:[#allocation1] sm:$0x1]  }
   0xd   :  { %8 = vst.msk [vmem:[#allocation0] sm:$0x1] %vm7_vm0, %v6_v4  }
  0x12   :  { %16 = vrot.lane.b32.xlu0 %v15_v3, %s38_s9 }
  0x7c   :  { %v11_v5 = vpop.permute.xlu0 %10  }
  0x7d   :  { %v23_v6 = vpop.permute.xlu1 %22   ;;  %14 = vst.msk [vmem:[#allocation0 + $0x1] sm:$0x1] %vm7_vm0, %v11_v5  }
  0x7e   :  { %26 = vst.msk [vmem:[#allocation0 + $0x3] sm:$0x1] %vm7_vm0, %v23_v6  }
  0x84   :  { %v17_v7 = vpop.permute.xlu0 %16  }
  0x85   :  { %20 = vst.msk [vmem:[#allocation0 + $0x2] sm:$0x1] %vm7_vm0, %v17_v7  }
  0x8c   :  { %v29_v8 = vld [vmem:[#allocation0] sm:$0xf] }
  0x8d   :  { %32 = vst [vmem:[%s56_s1] sm:$0xf] %v29_v8 }

// kernel: cartpole_ff_forward.1
= control target key start
LH: loop header
LB: loop body
LE: loop exit
PB: predicated region body
PF: predicated region fallthrough
CT: control target
= control target key end

     0   :  { %14 = vsyncpa [#allocation3], 0  ;;  %s510_s0 = inlined_call_operand.vmem [shape: f32[8,8], index: 0, kind: input, shape index: {}]   ;;  %s511_s1 = inlined_call_operand.vmem [shape: bf16[8,128], index: 1, kind: input, shape index: {}]   ;;  %s512_s2 = inlined_call_operand.vmem [shape: f32[1,128], index: 2, kind: input, shape index: {}]   ;;  %s513_s3 = inlined_call_operand.hbm [shape: bf16[128,128], index: 3, kind: input, shape index: {}]   ;;  %s514_s4 = inlined_call_operand.vmem [shape: f32[1,128], index: 4, kind: input, shape index: {}]   ;;  %s515_s5 = inlined_call_operand.hbm [shape: bf16[128,128], index: 5, kind: input, shape index: {}]   ;;  %s516_s6 = inlined_call_operand.vmem [shape: f32[1,128], index: 6, kind: input, shape index: {}]   ;;  %s517_s7 = inlined_call_operand.vmem [shape: bf16[8,128], index: 7, kind: output, shape index: {0}]   ;;  %s518_s8 = inlined_call_operand.vmem [shape: f32[8,8], index: 8, kind: output, shape index: {1}]  }
   0x1   :  { %s26_s29 = sshll.u32 %s513_s3, 4  ;;  %s27_s29 = int_to_ptr.hbm [resolvable:$true] %s26_s29 }
   0x2   :  { %15 = vsyncpa [#allocation5], 0  ;;  %s432_s30 = smov [#allocation2]   ;;  %s41_s12 = sshll.u32 %s515_s5, 4  ;;  %s42_s12 = int_to_ptr.hbm [resolvable:$true] %s41_s12 }
   0x3   :  { %s28_s9 = sshll.u32 %s432_s30, 4  ;;  %s433_s13 = smov 64   ;;  %s29_s9 = int_to_ptr.vmem [resolvable:$true] %s28_s9 }
   0x4   :  { %s434_s14 = smov 4   ;;  %s435_s15 = smov [#allocation4]  }
   0x5   :  { %34 = dma.hbm_to_vmem [thread:$0]  %s27_s29, 1024, %s29_s9, [#allocation3], %s433_s13, %s433_s13, %s434_s14  }
   0x6   :  { %s43_s16 = sshll.u32 %s435_s15, 4  ;;  %s44_s16 = int_to_ptr.vmem [resolvable:$true] %s43_s16 }
   0x7   :  { %49 = dma.hbm_to_vmem [thread:$0]  %s42_s12, 1024, %s44_s16, [#allocation5], %s433_s13, %s433_s13, %s434_s14  }
   0x8   :  { %428 = dma.done.wait [#allocation3], 1024  }
   0x9   :  { %429 = vsyncadd [#allocation3], 4294966272 }
   0xa   :  { %430 = dma.done.wait [#allocation5], 1024  }
   0xb   :  { %431 = vsyncadd [#allocation5], 4294966272  ;;  %vm72_vm0 = vcmask 1043456   ;;  %v63_v0 = vld [vmem:[%s511_s1] sm:$0xf]  ;;  %v360_v2 = vld [vmem:[#allocation2 + $0x38] sm:$0xff]  ;;  %v255_v32 = vlaneseq }
   0xc   :  { %v61_v1 = vld [vmem:[%s510_s0] sm:$0xff]  ;;  %v74_v3 = vsel %vm72_vm0, %v63_v0, 0  ;;  %vm68_vm1 = vcmask 64512   ;;  %159 = vmatpush.bf16.msra.mxu1 %v360_v2  ;;  %v359_v5 = vld [vmem:[#allocation2 + $0x30] sm:$0xff]  ;;  %v358_v6 = vld [vmem:[#allocation2 + $0x28] sm:$0xff] }
   0xd   :  { %v62_v4 = vpack.c.bf16 %v61_v1, %v61_v1  ;;  %83 = vmatpush.bf16.msra.mxu0 %v74_v3  ;;  %v357_v7 = vld [vmem:[#allocation2 + $0x20] sm:$0xff]  ;;  %v356_v8 = vld [vmem:[#allocation2 + $0x18] sm:$0xff]  ;;  %v355_v9 = vld [vmem:[#allocation2 + $0x10] sm:$0xff]  ;;  %v256_v33 = vand.u32 127, %v255_v32 }
   0xe   :  { %v354_v10 = vld [vmem:[#allocation2 + $0x8] sm:$0xff]  ;;  %v353_v11 = vld [vmem:[#allocation2] sm:$0xff]  ;;  %v368_v12 = vld [vmem:[#allocation4 + $0x38] sm:$0xff] }
   0xf   :  { %242 = vmatpush.bf16.msra.mxu2 %v368_v12  ;;  %v367_v13 = vld [vmem:[#allocation4 + $0x30] sm:$0xff]  ;;  %v366_v14 = vld [vmem:[#allocation4 + $0x28] sm:$0xff]  ;;  %v365_v15 = vld [vmem:[#allocation4 + $0x20] sm:$0xff]  ;;  %vm273_vm2 = vcmp.eq.s32.totalorder %v256_v33, 2  ;;  %vm257_vm3 = vcmp.lt.s32.totalorder %v256_v33, 2 }
  0x10   :  { %288 = vmatmul.msk.bf16.vlgmr.msra.gmra.mxu0 %vm68_vm1, %v62_v4  ;;  %160 = vmatpush.bf16.msra.mxu1 %v359_v5  ;;  %v364_v16 = vld [vmem:[#allocation4 + $0x18] sm:$0xff]  ;;  %v363_v17 = vld [vmem:[#allocation4 + $0x10] sm:$0xff]  ;;  %v373_v18 = vld [vmem:[%s512_s2] ss:$0 sm:$0xff] }
  0x11   :  { %v362_v24 = vld [vmem:[#allocation4 + $0x8] sm:$0xff]  ;;  %v361_v25 = vld [vmem:[#allocation4] sm:$0xff] }
  0x12   :  { %v374_v26 = vld [vmem:[%s514_s4] ss:$0 sm:$0xff] }
  0x13   :  { %243 = vmatpush.bf16.msra.mxu2 %v367_v13  ;;  %v375_v34 = vld [vmem:[%s516_s6] ss:$0 sm:$0xff] }
  0x14   :  { %161 = vmatpush.bf16.msra.mxu1 %v358_v6 }
  0x17   :  { %244 = vmatpush.bf16.msra.mxu2 %v366_v14 }
  0x18   :  { %162 = vmatpush.bf16.msra.mxu1 %v357_v7 }
  0x1b   :  { %245 = vmatpush.bf16.msra.mxu2 %v365_v15 }
  0x1c   :  { %163 = vmatpush.bf16.msra.mxu1 %v356_v8 }
  0x1f   :  { %246 = vmatpush.bf16.msra.mxu2 %v364_v16 }
  0x20   :  { %164 = vmatpush.bf16.msra.mxu1 %v355_v9 }
  0x23   :  { %247 = vmatpush.bf16.msra.mxu2 %v363_v17 }
  0x24   :  { %165 = vmatpush.bf16.msra.mxu1 %v354_v10 }
  0x27   :  { %248 = vmatpush.bf16.msra.mxu2 %v362_v24 }
  0x28   :  { %166 = vmatpush.bf16.msra.mxu1 %v353_v11 }
  0x2b   :  { %249 = vmatpush.bf16.msra.mxu2 %v361_v25 }
  0x8d   :  { %v85_v19 = vpop.f32.mrf.mxu0 }
  0x8e   :  { %v86_v20 = vadd.f32 %v373_v18, %v85_v19 }
  0x90   :  { %v89_v21 = vmax.f32 %v86_v20, 0.0 }
  0x92   :  { %v90_v22 = vpack.c.bf16 %v89_v21, %v89_v21 }
  0x94   :  { %167 = vmatmul.bf16.vlgmr.msra.gmra.mxu1 %v90_v22 }
  0x95   :  { %v87_v23 = vpop.f32.mrf.mxu0 }
 0x111   :  { %v168_v27 = vpop.f32.mrf.mxu1 }
 0x112   :  { %v169_v28 = vadd.f32 %v374_v26, %v168_v27 }
 0x114   :  { %v172_v29 = vmax.f32 %v169_v28, 0.0 }
 0x116   :  { %v173_v30 = vpack.c.bf16 %v172_v29, %v172_v29 }
 0x118   :  { %250 = vmatmul.bf16.vlgmr.msra.gmra.mxu2 %v173_v30 }
 0x119   :  { %v170_v31 = vpop.f32.mrf.mxu1 }
 0x19b   :  { %v251_v35 = vpop.f32.mrf.mxu2 }
 0x19c   :  { %v252_v36 = vadd.f32 %v375_v34, %v251_v35 }
 0x19e   :  { %v274_v37 = vsel %vm273_vm2, %v252_v36, 0.0  ;;  %v258_v38 = vsel %vm257_vm3, %v252_v36, -inf }
 0x19f   :  { %275 = vadd.xlane.f32.xlu1 %v274_v37  ;;  %259 = vmax.xlane.f32.xlu0 %v258_v38 }
 0x1a3   :  { %v253_v39 = vpop.f32.mrf.mxu2 }
 0x212   :  { %v276_v40 = vpop.xlane.xlu1 %275  ;;  %v260_v41 = vpop.xlane.xlu0 %259 }
 0x213   :  { %277 = vst.msk [vmem:[%s518_s8] sm:$0xff] %vm68_vm1, %v276_v40  ;;  %v261_v42 = vsub.f32 %v258_v38, %v260_v41 }
 0x215   :  { %v262_v43 = vmul.f32 1.442695, %v261_v42 }
 0x217   :  { %376 = vpow2.f32 %v262_v43 }
 0x21d   :  { %v377_v44 = vpop.eup %376 }
 0x21e   :  { %264 = vadd.xlane.f32.xlu0 %v377_v44 }
 0x291   :  { %v265_v45 = vpop.xlane.xlu0 %264 }
 0x292   :  { %378 = vrcp.f32 %v265_v45 }
 0x298   :  { %v379_v46 = vpop.eup %378 }
 0x299   :  { %v267_v47 = vmul.f32 %v379_v46, %v265_v45 }
 0x29b   :  { %v268_v48 = vsub.f32 2.0, %v267_v47 }
 0x29d   :  { %v269_v49 = vmul.f32 %v379_v46, %v268_v48 }
 0x29f   :  { %v270_v50 = vmul.f32 %v377_v44, %v269_v49 }
 0x2a1   :  { %v271_v51 = vpack.c.bf16 %v270_v50, %v270_v50 }
 0x2a3   :  { %272 = vst [vmem:[%s517_s7] sm:$0xf] %v271_v51 }
 0x2a4   :  { %286 = vsyncpa [#allocation3], 1 }
 0x2a5   :  { %287 = vsyncpa [#allocation5], 1 }

</bundles_post_ra>
